<compile_context>
chip_gen: v6e
topology: v6e:2x2x1
jax: 0.10.0
libtpu: 0.0.40
codegen_flags: <defaults>
</compile_context>

<pallas_src>
import functools

import numpy as np
import jax
import jax.numpy as jnp
from jax.experimental import pallas as pl
from jax.experimental.pallas import tpu as pltpu


def _round_up(v, m):
    return ((v + m - 1) // m) * m


# ----------------------------- GCN encoder kernels -----------------------------

_GCN_TILE = 512   # max A_hat tile (row and reduction); decoupled from N padding


def _gcn_feat_kernel(x_ref, w_ref, out_ref):
    # XW = X @ W  (per row tile; bf16 MXU / f32 accumulation)
    out_ref[...] = jnp.dot(
        x_ref[...], w_ref[...], preferred_element_type=jnp.float32
    ).astype(jnp.bfloat16)


def _gcn_agg_fused_kernel(ks_ref, kc_ref, a_ref, xw_ref, b_ref, w_next_ref,
                          out_ref, acc_ref):
    # out = relu(A_hat @ XW + b) @ W_next   (layer-1 aggregate + fused layer-2 transform)
    i = pl.program_id(0)
    k = pl.program_id(1)

    @pl.when(k == 0)
    def _():
        acc_ref[...] = jnp.zeros_like(acc_ref)

    @pl.when(k < kc_ref[i])      # skip all-zero off-block-diagonal A tiles
    def _():
        acc_ref[...] += jnp.dot(a_ref[...], xw_ref[...],
                                preferred_element_type=jnp.float32)

    @pl.when(k == pl.num_programs(1) - 1)
    def _():
        h1 = jnp.maximum(acc_ref[...] + b_ref[...], 0.0)
        out_ref[...] = jnp.dot(h1.astype(jnp.bfloat16), w_next_ref[...],
                               preferred_element_type=jnp.float32).astype(jnp.bfloat16)


def _gcn_agg_final_kernel(ks_ref, kc_ref, a_ref, xw_ref, b_ref, out_ref, acc_ref):
    # out = A_hat @ XW + b                  (last GCN layer: no activation)
    i = pl.program_id(0)
    k = pl.program_id(1)

    @pl.when(k == 0)
    def _():
        acc_ref[...] = jnp.zeros_like(acc_ref)

    @pl.when(k < kc_ref[i])
    def _():
        acc_ref[...] += jnp.dot(a_ref[...], xw_ref[...],
                                preferred_element_type=jnp.float32)

    @pl.when(k == pl.num_programs(1) - 1)
    def _():
        out_ref[...] = acc_ref[...] + b_ref[...]


# index_maps: scalar-prefetch refs (k-start / k-count per row tile) arrive positionally
def _agg_a_index(i, k, ks_ref, kc_ref):
    return (i, ks_ref[i] + jnp.minimum(k, kc_ref[i] - 1))


def _agg_xw_index(i, k, ks_ref, kc_ref):
    return (ks_ref[i] + jnp.minimum(k, kc_ref[i] - 1), 0)


def _agg_const_index(i, k, ks_ref, kc_ref):
    return (0, 0)


def _agg_out_index(i, k, ks_ref, kc_ref):
    return (i, 0)


def _tile_k_ranges(graph_sizes, n, n_pad, tile):
    """Per-row-tile [k_start, k_count) in tile units covering the non-zero
    (block-diagonal) columns of A_hat for that row tile (host-side NumPy)."""
    bounds = np.concatenate([[0], np.cumsum(graph_sizes)]).astype(np.int64)
    row_blocks = n_pad // tile
    ks = np.zeros((row_blocks,), np.int32)
    kc = np.ones((row_blocks,), np.int32)
    for i in range(row_blocks):
        r0 = i * tile
        if r0 >= n:                       # all-padding row tile (A rows are zero)
            continue
        r1 = min((i + 1) * tile, n) - 1
        g0 = int(np.searchsorted(bounds, r0, side="right")) - 1
        g1 = int(np.searchsorted(bounds, r1, side="right")) - 1
        c0 = int(bounds[g0])
        c1 = int(bounds[g1 + 1]) - 1
        ks[i] = c0 // tile
        kc[i] = c1 // tile - ks[i] + 1
    return ks, kc, int(kc.max())


def gcn_forward(a_hat, x, w1, b1, w2, b2, graph_sizes):
    """2-layer GCN: A@(relu(A@(X W1)+b1) W2)+b2, block-diagonal-aware, bf16 MXU/f32 acc.

    Returns the padded [n_pad, h_pad] f32 result; only rows < N and cols < hid are used.
    """
    n, f = x.shape
    hid = w2.shape[1]
    # Decouple N padding from the max tile: small batches pad only to 128.
    tile = _GCN_TILE if n > _GCN_TILE else _round_up(n, 128)
    n_pad = _round_up(n, tile)
    f_pad = _round_up(f, 128)
    h_pad = _round_up(hid, 128)

    a_p = jnp.pad(a_hat.astype(jnp.bfloat16), ((0, n_pad - n), (0, n_pad - n)))
    x_p = jnp.pad(x.astype(jnp.bfloat16), ((0, n_pad - n), (0, f_pad - f)))
    w1_p = jnp.pad(w1.astype(jnp.bfloat16), ((0, f_pad - f), (0, h_pad - hid)))
    w2_p = jnp.pad(w2.astype(jnp.bfloat16), ((0, h_pad - hid), (0, h_pad - hid)))
    b1_p = jnp.pad(b1.astype(jnp.float32), (0, h_pad - hid)).reshape(1, h_pad)
    b2_p = jnp.pad(b2.astype(jnp.float32), (0, h_pad - hid)).reshape(1, h_pad)

    row_blocks = n_pad // tile
    ks_np, kc_np, kc_max = _tile_k_ranges(graph_sizes, n, n_pad, tile)
    ks = jnp.asarray(ks_np)
    kc = jnp.asarray(kc_np)

    # --- XW1 = X @ W1 (row-tiled feature transform) ---
    xw1 = pl.pallas_call(
        _gcn_feat_kernel,
        out_shape=jax.ShapeDtypeStruct((n_pad, h_pad), jnp.bfloat16),
        grid=(row_blocks,),
        in_specs=[
            pl.BlockSpec((tile, f_pad), lambda i: (i, 0)),
            pl.BlockSpec((f_pad, h_pad), lambda i: (0, 0)),
        ],
        out_specs=pl.BlockSpec((tile, h_pad), lambda i: (i, 0)),
        compiler_params=pltpu.CompilerParams(dimension_semantics=("parallel",)),
    )(x_p, w1_p)

    # --- XW2 = relu(A @ XW1 + b1) @ W2 (block-diag-aware aggregate + fused transform) ---
    xw2 = pl.pallas_call(
        _gcn_agg_fused_kernel,
        out_shape=jax.ShapeDtypeStruct((n_pad, h_pad), jnp.bfloat16),
        grid_spec=pltpu.PrefetchScalarGridSpec(
            num_scalar_prefetch=2,
            grid=(row_blocks, kc_max),
            in_specs=[
                pl.BlockSpec((tile, tile), _agg_a_index),      # A_hat tile
                pl.BlockSpec((tile, h_pad), _agg_xw_index),    # XW1 tile
                pl.BlockSpec((1, h_pad), _agg_const_index),    # b1
                pl.BlockSpec((h_pad, h_pad), _agg_const_index),  # W2
            ],
            out_specs=pl.BlockSpec((tile, h_pad), _agg_out_index),
            scratch_shapes=[pltpu.VMEM((tile, h_pad), jnp.float32)],
        ),
        compiler_params=pltpu.CompilerParams(
            dimension_semantics=("parallel", "arbitrary")),
    )(ks, kc, a_p, xw1, b1_p, w2_p)

    # --- hidden = A @ XW2 + b2 ---
    hidden = pl.pallas_call(
        _gcn_agg_final_kernel,
        out_shape=jax.ShapeDtypeStruct((n_pad, h_pad), jnp.float32),
        grid_spec=pltpu.PrefetchScalarGridSpec(
            num_scalar_prefetch=2,
            grid=(row_blocks, kc_max),
            in_specs=[
                pl.BlockSpec((tile, tile), _agg_a_index),
                pl.BlockSpec((tile, h_pad), _agg_xw_index),
                pl.BlockSpec((1, h_pad), _agg_const_index),
            ],
            out_specs=pl.BlockSpec((tile, h_pad), _agg_out_index),
            scratch_shapes=[pltpu.VMEM((tile, h_pad), jnp.float32)],
        ),
        compiler_params=pltpu.CompilerParams(
            dimension_semantics=("parallel", "arbitrary")),
    )(ks, kc, a_p, xw2, b2_p)

    return hidden


# ------------------------------- GRU decoder kernel ----------------------------

def _gru_stack_kernel(x_ref, h0_ref, wih_ref, whh_ref, bih_ref, bhh_ref,
                      out_ref, h_scr, y_scr, gi_scr, *, tt, bc, h_pad, layers):
    # x_ref / out_ref: [tt*bc, h_pad] block of the (chunk-major, time-major) sequence.
    # All decoder layers run inside one kernel; inter-layer activations stay in VMEM
    # (y_scr) and every layer's hidden state is carried across time-block grid steps
    # in h_scr[layer].
    @pl.when(pl.program_id(1) == 0)
    def _():
        for l in range(layers):
            h_scr[l] = h0_ref[...]

    for l in range(layers):
        # Hoisted bf16 input projection for the whole time block: ONE MXU matmul;
        # only the recurrent matmul stays inside the serial unrolled loop.
        x_in = x_ref[...] if l == 0 else y_scr[...]
        gi_scr[...] = (
            jnp.dot(x_in.astype(jnp.bfloat16), wih_ref[l],
                    preferred_element_type=jnp.float32) + bih_ref[l])
        whh = whh_ref[l]
        bhh = bhh_ref[l]
        last = (l == layers - 1)

        def step(i, carry):
            h_prev = h_scr[l]                                               # [8, H]
            gh = jnp.dot(h_prev.astype(jnp.bfloat16), whh,
                         preferred_element_type=jnp.float32) + bhh          # [8, 3H]
            row = pl.multiple_of(i * bc, bc)
            gi = gi_scr[pl.ds(row, bc), :]                                  # [8, 3H]
            # Gate slices are full 128-lane tiles (H padded to 128) -> no masked ops.
            r = jax.nn.sigmoid(gi[:, 0 * h_pad:1 * h_pad] + gh[:, 0 * h_pad:1 * h_pad])
            z = jax.nn.sigmoid(gi[:, 1 * h_pad:2 * h_pad] + gh[:, 1 * h_pad:2 * h_pad])
            nn_ = jnp.tanh(gi[:, 2 * h_pad:3 * h_pad] + r * gh[:, 2 * h_pad:3 * h_pad])
            h_new = (1.0 - z) * nn_ + z * h_prev
            h_scr[l] = h_new
            if last:
                out_ref[pl.ds(row, bc), :] = h_new     # single lane-dense store per step
            else:
                y_scr[pl.ds(row, bc), :] = h_new       # inter-layer activations: VMEM only
            return carry

        jax.lax.fori_loop(0, tt, step, 0, unroll=True)


def _pack_gru_weight(w, hid, h_pad):
    # torch [3*hid, hid] (gates r,z,n stacked) -> [h_pad, 3*h_pad] so the kernel computes
    # x @ W^T with each gate occupying its own 128-lane column block (host-side NumPy).
    w = np.asarray(w, dtype=np.float32)
    out = np.zeros((h_pad, 3 * h_pad), np.float32)
    for g in range(3):
        out[:hid, g * h_pad:g * h_pad + hid] = w[g * hid:(g + 1) * hid, :].T
    return out


def _pack_gru_bias(bias, hid, h_pad):
    bias = np.asarray(bias, dtype=np.float32)
    out = np.zeros((1, 3 * h_pad), np.float32)
    for g in range(3):
        out[0, g * h_pad:g * h_pad + hid] = bias[g * hid:(g + 1) * hid]
    return out


def gru_forward(x_flat, h0, w_ih, w_hh, b_ih, b_hh, *, hid, tt, s_pad, b_chunks):
    """Fused multi-layer GRU over the [b_chunks * s_pad * 8, h_pad] padded sequence."""
    rows, h_pad = x_flat.shape
    layers = int(w_ih.shape[0])
    blk_rows = tt * 8
    n_tblocks = s_pad // tt

    wih = jnp.asarray(np.stack([_pack_gru_weight(w_ih[l], hid, h_pad)
                                for l in range(layers)]), jnp.bfloat16)
    whh = jnp.asarray(np.stack([_pack_gru_weight(w_hh[l], hid, h_pad)
                                for l in range(layers)]), jnp.bfloat16)
    bih = jnp.asarray(np.stack([_pack_gru_bias(b_ih[l], hid, h_pad)
                                for l in range(layers)]), jnp.float32)
    bhh = jnp.asarray(np.stack([_pack_gru_bias(b_hh[l], hid, h_pad)
                                for l in range(layers)]), jnp.float32)

    # TODO(synk): inter-layer GRU dropout is a training-time no-op (eval mode).
    kern = functools.partial(_gru_stack_kernel, tt=tt, bc=8, h_pad=h_pad, layers=layers)
    return pl.pallas_call(
        kern,
        out_shape=jax.ShapeDtypeStruct((rows, h_pad), jnp.float32),
        grid=(b_chunks, n_tblocks),
        in_specs=[
            pl.BlockSpec((blk_rows, h_pad), lambda c, t: (c * n_tblocks + t, 0)),  # x block
            pl.BlockSpec((8, h_pad), lambda c, t: (c, 0)),                          # h0 chunk
            # tiny VMEM-resident constants (constant index maps: fetched once)
            pl.BlockSpec((layers, h_pad, 3 * h_pad), lambda c, t: (0, 0, 0)),       # W_ih^T
            pl.BlockSpec((layers, h_pad, 3 * h_pad), lambda c, t: (0, 0, 0)),       # W_hh^T
            pl.BlockSpec((layers, 1, 3 * h_pad), lambda c, t: (0, 0, 0)),           # b_ih
            pl.BlockSpec((layers, 1, 3 * h_pad), lambda c, t: (0, 0, 0)),           # b_hh
        ],
        out_specs=pl.BlockSpec((blk_rows, h_pad), lambda c, t: (c * n_tblocks + t, 0)),
        scratch_shapes=[
            pltpu.VMEM((layers, 8, h_pad), jnp.float32),     # per-layer hidden carry
            pltpu.VMEM((blk_rows, h_pad), jnp.float32),      # inter-layer block activations
            pltpu.VMEM((blk_rows, 3 * h_pad), jnp.float32),  # hoisted input projection
        ],
        compiler_params=pltpu.CompilerParams(
            # batch-chunk axis "parallel": v7x's two TensorCores split independent graphs
            dimension_semantics=("parallel", "arbitrary")),
    )(x_flat, h0, wih, whh, bih, bhh)


# ---------------------------------- host glue ----------------------------------

def build_a_hat(graph_sizes, edges_per_graph):
    """Dense symmetric GCN-normalized adjacency with self loops (built host-side in NumPy)."""
    n = int(sum(graph_sizes))
    a = np.zeros((n, n), np.float32)
    off = 0
    for n_i, edges in zip(graph_sizes, edges_per_graph):
        for (u, v) in edges:
            a[off + u, off + v] = 1.0
            a[off + v, off + u] = 1.0
        off += n_i
    a += np.eye(n, dtype=np.float32)
    d_inv_sqrt = 1.0 / np.sqrt(a.sum(axis=1))
    return jnp.asarray(a * d_inv_sqrt[:, None] * d_inv_sqrt[None, :])


def _pad_gather_indices(graph_sizes, s_pad, b_chunks, n_total):
    # Row r = (chunk*s_pad + t)*8 + lane of the GRU input is node row idx[r] of an
    # [n_total + 1] table (last row = zeros): ONE gather == pad_sequence.
    offsets = np.concatenate([[0], np.cumsum(graph_sizes)]).astype(np.int64)
    idx = np.full((b_chunks, s_pad, 8), n_total, dtype=np.int32)
    for g, sz in enumerate(graph_sizes):
        c, lane = divmod(g, 8)
        idx[c, :sz, lane] = offsets[g] + np.arange(sz)
    return jnp.asarray(idx.reshape(-1))


def _unpad_gather_indices(graph_sizes, s_pad):
    # Valid rows of the flattened GRU output, in graph order
    # (= torch.cat([x_[i, :len_i] for i])).
    rows = []
    for g, sz in enumerate(graph_sizes):
        c, lane = divmod(g, 8)
        rows.append((c * s_pad + np.arange(sz)) * 8 + lane)
    return jnp.asarray(np.concatenate(rows).astype(np.int32))


def deeptralog_forward(x, a_hat, graph_sizes, params):
    """Mirrors DeepTraLog_Base.forward for a batch of graphs (eval mode)."""
    n, in_dim = x.shape
    hid = params["w2"].shape[1]
    b = len(graph_sizes)
    s_max = int(max(graph_sizes))

    h_pad = _round_up(hid, 128)
    b_chunks = _round_up(b, 8) // 8
    # tt = timesteps per GRU grid step; 32 fills the 256-deep MXU on v6e/v7x
    # (drop to 16 on v5e if tuning per-generation).
    tt = min(s_max, 32)
    s_pad = _round_up(s_max, tt)

    # ---- shared GCN encoder (Pallas, block-diag-aware, bf16 MXU) ----
    hidden_p = gcn_forward(a_hat, x, params["w1"], params["b1"],
                           params["w2"], params["b2"], graph_sizes)   # [n_pad, h_pad] f32

    # ---- padding glue: single gathers instead of per-graph Python slicing ----
    gather_idx = _pad_gather_indices(graph_sizes, s_pad, b_chunks, n)
    zero_row = jnp.zeros((1, h_pad), jnp.float32)

    h_table = jnp.concatenate([hidden_p[:n], zero_row], axis=0)
    batched_h = jnp.take(h_table, gather_idx, axis=0)      # [b_chunks*s_pad*8, h_pad]

    x_table = jnp.concatenate(
        [jnp.pad(x.astype(jnp.float32), ((0, 0), (0, h_pad - in_dim))), zero_row],
        axis=0)
    batched_x = jnp.take(x_table, gather_idx, axis=0).reshape(b_chunks, s_pad, 8, h_pad)

    # h0: mean over the *padded* time axis (divides by s_max, zero rows included) —
    # faithfully matches the reference; same initial state for every decoder layer.
    h0 = (batched_x.sum(axis=1) / jnp.float32(s_max)).reshape(b_chunks * 8, h_pad)

    # ---- fused multi-layer GRU decoder (Pallas) ----
    out_flat = gru_forward(batched_h, h0,
                           params["w_ih"], params["w_hh"],
                           params["b_ih"], params["b_hh"],
                           hid=hid, tt=tt, s_pad=s_pad, b_chunks=b_chunks)

    # ---- un-pad: keep only the valid rows, in graph order ----
    x_dense = jnp.take(out_flat, _unpad_gather_indices(graph_sizes, s_pad), axis=0)
    return x_dense[:, :hid]


# ------------------------------ pure-JAX reference ------------------------------

def _reference_forward(x, a_hat, graph_sizes, params):
    """Reference mirroring the PyTorch module, using the same bf16-operand / f32-accumulate
    MXU policy as the kernels (GCN and GRU matmuls) so the comparison isolates the tiling."""
    bf16, f32 = jnp.bfloat16, jnp.float32

    def mm(a, bmat):
        return jnp.dot(a.astype(bf16), bmat.astype(bf16), preferred_element_type=f32)

    h1 = jnp.maximum(mm(a_hat, mm(x, params["w1"])) + params["b1"], 0.0)
    hidden = mm(a_hat, mm(h1, params["w2"])) + params["b2"]

    b = len(graph_sizes)
    s_max = max(graph_sizes)
    hid = params["w2"].shape[1]
    offs = np.concatenate([[0], np.cumsum(graph_sizes)])

    def pad_seq(arr):
        return jnp.stack([
            jnp.pad(arr[offs[i]:offs[i + 1]], ((0, s_max - graph_sizes[i]), (0, 0)))
            for i in range(b)])

    batched_x = pad_seq(x)
    batched_h = pad_seq(hidden)
    h0 = batched_x.mean(axis=1)                                  # same h0 for all layers

    x_seq = batched_h                                            # [B, S, H]
    for l in range(params["w_ih"].shape[0]):
        h = h0
        ys = []
        for t in range(s_max):
            gi = mm(x_seq[:, t], params["w_ih"][l].T) + params["b_ih"][l]
            gh = mm(h, params["w_hh"][l].T) + params["b_hh"][l]
            r = jax.nn.sigmoid(gi[:, :hid] + gh[:, :hid])
            z = jax.nn.sigmoid(gi[:, hid:2 * hid] + gh[:, hid:2 * hid])
            nn_ = jnp.tanh(gi[:, 2 * hid:] + r * gh[:, 2 * hid:])
            h = (1.0 - z) * nn_ + z * h
            ys.append(h)
        x_seq = jnp.stack(ys, axis=1)
    return jnp.concatenate([x_seq[i, :graph_sizes[i]] for i in range(b)], axis=0)


# ------------------------------------ main --------------------------------------

if __name__ == "__main__":
    # DeepTraLog_Base(in_dim=32, hid_dim=32, num_layers=4, dropout=0.1, act=ReLU)
    # encoder_layers = 2 (GCN), decoder_layers = 2 (GRU).  in_dim must equal hid_dim
    # for h0 to be a valid GRU initial state, exactly as in the reference code.
    in_dim = hid_dim = 32
    num_layers = 4
    dec_layers = num_layers // 2

    graph_sizes = [5, 3]                  # two graphs in the Batch, 8 nodes total
    edges = [
        [(0, 1), (1, 2), (2, 3), (3, 4), (0, 2)],   # graph 0
        [(0, 1), (1, 2)],                            # graph 1
    ]
    n_total = sum(graph_sizes)

    key = jax.random.PRNGKey(0)
    ks = jax.random.split(key, 8)

    x = jax.random.normal(ks[0], (n_total, in_dim), jnp.float32)
    a_hat = build_a_hat(graph_sizes, edges)

    g_scale = float(1.0 / np.sqrt(in_dim))
    r_scale = float(1.0 / np.sqrt(hid_dim))
    params = {
        # GCN layer weights stored as [in, out] (kernel computes x @ W)
        "w1": jax.random.uniform(ks[1], (in_dim, hid_dim), jnp.float32, -g_scale, g_scale),
        "b1": jnp.zeros((hid_dim,), jnp.float32),
        "w2": jax.random.uniform(ks[2], (hid_dim, hid_dim), jnp.float32, -g_scale, g_scale),
        "b2": jnp.zeros((hid_dim,), jnp.float32),
        # GRU weights, PyTorch layout: [L, 3H, H] with gate order (r, z, n)
        "w_ih": jax.random.uniform(ks[3], (dec_layers, 3 * hid_dim, hid_dim),
                                   jnp.float32, -r_scale, r_scale),
        "w_hh": jax.random.uniform(ks[4], (dec_layers, 3 * hid_dim, hid_dim),
                                   jnp.float32, -r_scale, r_scale),
        "b_ih": jax.random.uniform(ks[5], (dec_layers, 3 * hid_dim),
                                   jnp.float32, -r_scale, r_scale),
        "b_hh": jax.random.uniform(ks[6], (dec_layers, 3 * hid_dim),
                                   jnp.float32, -r_scale, r_scale),
    }

    out = deeptralog_forward(x, a_hat, graph_sizes, params)
    out = jax.block_until_ready(out)
    assert out.shape == (n_total, hid_dim)

    ref = jax.block_until_ready(_reference_forward(x, a_hat, graph_sizes, params))
    np.testing.assert_allclose(np.asarray(out), np.asarray(ref), rtol=2e-2, atol=2e-2)

    print("KERNEL_OK")
</pallas_src>

<mosaic_0001>
module attributes {stable_mosaic.version = 11 : i64} {
  func.func @_gcn_feat_kernel(%arg0: i32, %arg1: memref<128x128xbf16, #tpu.memory_space<vmem>>, %arg2: memref<128x128xbf16, #tpu.memory_space<vmem>>, %arg3: memref<128x128xbf16, #tpu.memory_space<vmem>>) attributes {dimension_semantics = [#tpu.dimension_semantics<parallel>], iteration_bounds = array<i64: 1>, scalar_prefetch = 0 : i64, scratch_operands = 0 : i64, tpu.core_type = #tpu.core_type<tc>, window_params = [{transform_indices = @transform_0, window_bounds = array<i64: 128, 128>}, {pipeline_mode = #tpu.pipeline_mode<synchronous>, transform_indices = @transform_1, window_bounds = array<i64: 128, 128>}, {transform_indices = @transform_2, window_bounds = array<i64: 128, 128>}]} {
    %c0 = arith.constant 0 : index
    %c0_0 = arith.constant 0 : index
    %0 = vector.load %arg1[%c0, %c0_0] : memref<128x128xbf16, #tpu.memory_space<vmem>>, vector<128x128xbf16>
    %c0_1 = arith.constant 0 : index
    %c0_2 = arith.constant 0 : index
    %1 = vector.load %arg2[%c0_1, %c0_2] : memref<128x128xbf16, #tpu.memory_space<vmem>>, vector<128x128xbf16>
    %cst = arith.constant dense<0.000000e+00> : vector<128x128xf32>
    %2 = tpu.matmul %0, %1, %cst {dimension_numbers = #tpu.dot_dimension_numbers<[1], [0], [0], [1], [0, 0, 1, 1], [], []>} : vector<128x128xbf16>, vector<128x128xbf16>, vector<128x128xf32> -> vector<128x128xf32>
    %3 = arith.truncf %2 : vector<128x128xf32> to vector<128x128xbf16>
    %c0_3 = arith.constant 0 : index
    %c0_4 = arith.constant 0 : index
    %4 = vector.load %arg3[%c0_3, %c0_4] : memref<128x128xbf16, #tpu.memory_space<vmem>>, vector<128x128xbf16>
    tpu.vector_store %arg3[%c0_3, %c0_4], %3 {strides = array<i32>} : memref<128x128xbf16, #tpu.memory_space<vmem>>, vector<128x128xbf16>,
    return
  }
  func.func @transform_0(%arg0: i32) -> (i32, i32) {
    %c0_i32 = arith.constant 0 : i32
    %c0_i32_0 = arith.constant 0 : i32
    return %arg0, %c0_i32 : i32, i32
  }
  func.func @transform_1(%arg0: i32) -> (i32, i32) {
    %c0_i32 = arith.constant 0 : i32
    %c0_i32_0 = arith.constant 0 : i32
    %c0_i32_1 = arith.constant 0 : i32
    return %c0_i32, %c0_i32_0 : i32, i32
  }
  func.func @transform_2(%arg0: i32) -> (i32, i32) {
    %c0_i32 = arith.constant 0 : i32
    %c0_i32_0 = arith.constant 0 : i32
    return %arg0, %c0_i32 : i32, i32
  }
}

</mosaic_0001>

<bundles_post_ra>
// kernel: tpu_custom_call.1
= control target key start
LH: loop header
LB: loop body
LE: loop exit
PB: predicated region body
PF: predicated region fallthrough
CT: control target
= control target key end

     0   :  { %7 = vsyncpa [#allocation3], 0  ;;  %s648_s0 = inlined_call_operand.hbm [shape: bf16[128,128], index: 0, kind: input, shape index: {}]   ;;  %s649_s1 = inlined_call_operand.hbm [shape: bf16[128,128], index: 1, kind: input, shape index: {}]   ;;  %s650_s2 = inlined_call_operand.hbm [shape: bf16[128,128], index: 2, kind: output, shape index: {}]  }
   0x1   :  { %8 = vsyncpa [#allocation6], 0 }
   0x2   :  { %9 = vsyncpa [#allocation4], 0  ;;  %s610_s9 = smov [#allocation2]  }
   0x3   :  { %s15_s10 = sshll.u32 %s610_s9, 4  ;;  %s16_s10 = int_to_ptr.vmem [resolvable:$true] %s15_s10 }
   0x4   :  { %s552_s11 = scalar_lea.vmem %s16_s10, 1024  ;;  %p557_p1 = scmp.lt.s32.totalorder %s16_s10, %s16_s10 }
   0x5   :  { %p553_p0 = scmp.ne.s32.totalorder %s16_s10, %s552_s11  ;;  %p558_p2 = scmp.lt.s32.totalorder %s552_s11, %s552_s11 }
   0x7   :  { %p559_p3 = por %p558_p2, %p557_p1 }
   0x9   :  { %p560_p4 = pnand %p559_p3, %p553_p0 }
   0xb   :  { %563 = shalt.err (!%p560_p4)
}
   0xc   :  { %s611_s12 = smov 64   ;;  %s612_s13 = smov 4  }
   0xd   :  { %21 = dma.hbm_to_vmem [thread:$0]  %s648_s0, 1024, %s16_s10, [#allocation3], %s611_s12, %s611_s12, %s612_s13  }
   0xe   :  { %s613_s16 = smov [#allocation5]  }
   0xf   :  { %s27_s17 = sshll.u32 %s613_s16, 4  ;;  %s28_s17 = int_to_ptr.vmem [resolvable:$true] %s27_s17 }
  0x10   :  { %s572_s18 = scalar_lea.vmem %s28_s17, 1024  ;;  %p577_p6 = scmp.lt.s32.totalorder %s28_s17, %s28_s17 }
  0x11   :  { %p573_p5 = scmp.ne.s32.totalorder %s28_s17, %s572_s18  ;;  %p578_p7 = scmp.lt.s32.totalorder %s572_s18, %s572_s18 }
  0x13   :  { %p579_p8 = por %p578_p7, %p577_p6 }
  0x15   :  { %p580_p9 = pnand %p579_p8, %p573_p5 }
  0x17   :  { %583 = shalt.err (!%p580_p9)
}
  0x18   :  { %33 = dma.hbm_to_vmem [thread:$0]  %s649_s1, 1024, %s28_s17, [#allocation6], %s611_s12, %s611_s12, %s612_s13  }
  0x19   :  { %604 = dma.done.wait [#allocation3], 1024  }
  0x1a   :  { %605 = vsyncadd [#allocation3], 4294966272 }
  0x1b   :  { %606 = dma.done.wait [#allocation6], 1024  }
  0x1c   :  { %607 = vsyncadd [#allocation6], 4294966272  ;;  %v528_v0 = vld [vmem:[#allocation5 + $0x38] sm:$0xff]   ;;  %v529_v1 = vld [vmem:[#allocation5 + $0x30] sm:$0xff]   ;;  %s614_s0 = smov [#allocation7]  }
  0x1d   :  { %475 = vmatprep.subr.bf16.mxu0 %v528_v0  ;;  %507 = vmatprep.subr.bf16.mxu1 %v528_v0  ;;  %v530_v2 = vld [vmem:[#allocation5 + $0x28] sm:$0xff]   ;;  %v531_v3 = vld [vmem:[#allocation5 + $0x20] sm:$0xff]   ;;  %v532_v6 = vld [vmem:[#allocation5 + $0x18] sm:$0xff]   ;;  %s351_s1 = sshll.u32 %s614_s0, 4  ;;  %s352_s1 = int_to_ptr.vmem [resolvable:$true] %s351_s1 }
  0x1e   :  { %476 = vmatpush3.bf16.msra.mxu0 %v528_v0  ;;  %515 = vmatpush3.bf16.msra.mxu1 %v528_v0  ;;  %v536_v4 = vld [vmem:[#allocation2] sm:$0xff]   ;;  %v533_v7 = vld [vmem:[#allocation5 + $0x10] sm:$0xff]   ;;  %v534_v8 = vld [vmem:[#allocation5 + $0x8] sm:$0xff]   ;;  %s584_s21 = scalar_lea.vmem %s352_s1, 1024  ;;  %p589_p11 = scmp.lt.s32.totalorder %s352_s1, %s352_s1 }
  0x1f   :  { %477 = vmatprep.subr.bf16.mxu0 %v529_v1  ;;  %508 = vmatprep.subr.bf16.mxu1 %v529_v1  ;;  %v537_v5 = vld [vmem:[#allocation2 + $0x20] sm:$0xff]   ;;  %v538_v10 = vld [vmem:[#allocation2 + $0x8] sm:$0xff]   ;;  %v540_v12 = vld [vmem:[#allocation2 + $0x10] sm:$0xff]   ;;  %p585_p10 = scmp.ne.s32.totalorder %s352_s1, %s584_s21  ;;  %p590_p12 = scmp.lt.s32.totalorder %s584_s21, %s584_s21 }
  0x20   :  { %491 = vmatprep.mubr.bf16.mxu0 %v536_v4  ;;  %499 = vmatprep.mubr.bf16.mxu1 %v537_v5  ;;  %v535_v9 = vld [vmem:[#allocation5] sm:$0xff]   ;;  %v539_v11 = vld [vmem:[#allocation2 + $0x28] sm:$0xff]   ;;  %v541_v13 = vld [vmem:[#allocation2 + $0x30] sm:$0xff]  }
  0x21   :  { %v542_v14 = vld [vmem:[#allocation2 + $0x18] sm:$0xff]   ;;  %p591_p13 = por %p590_p12, %p589_p11 }
  0x22   :  { %478 = vmatpush3.bf16.msra.mxu0 %v529_v1  ;;  %516 = vmatpush3.bf16.msra.mxu1 %v529_v1  ;;  %v543_v15 = vld [vmem:[#allocation2 + $0x38] sm:$0xff]  }
  0x23   :  { %479 = vmatprep.subr.bf16.mxu0 %v530_v2  ;;  %509 = vmatprep.subr.bf16.mxu1 %v530_v2  ;;  %p592_p0 = pnand %p591_p13, %p585_p10 }
  0x26   :  { %480 = vmatpush3.bf16.msra.mxu0 %v530_v2  ;;  %517 = vmatpush3.bf16.msra.mxu1 %v530_v2 }
  0x27   :  { %481 = vmatprep.subr.bf16.mxu0 %v531_v3  ;;  %510 = vmatprep.subr.bf16.mxu1 %v531_v3 }
  0x2a   :  { %482 = vmatpush3.bf16.msra.mxu0 %v531_v3  ;;  %518 = vmatpush3.bf16.msra.mxu1 %v531_v3 }
  0x2b   :  { %483 = vmatprep.subr.bf16.mxu0 %v532_v6  ;;  %511 = vmatprep.subr.bf16.mxu1 %v532_v6 }
  0x2e   :  { %484 = vmatpush3.bf16.msra.mxu0 %v532_v6  ;;  %519 = vmatpush3.bf16.msra.mxu1 %v532_v6 }
  0x2f   :  { %485 = vmatprep.subr.bf16.mxu0 %v533_v7  ;;  %512 = vmatprep.subr.bf16.mxu1 %v533_v7 }
  0x32   :  { %486 = vmatpush3.bf16.msra.mxu0 %v533_v7  ;;  %520 = vmatpush3.bf16.msra.mxu1 %v533_v7 }
  0x33   :  { %487 = vmatprep.subr.bf16.mxu0 %v534_v8  ;;  %513 = vmatprep.subr.bf16.mxu1 %v534_v8 }
  0x36   :  { %488 = vmatpush3.bf16.msra.mxu0 %v534_v8  ;;  %521 = vmatpush3.bf16.msra.mxu1 %v534_v8 }
  0x37   :  { %489 = vmatprep.subr.bf16.mxu0 %v535_v9  ;;  %514 = vmatprep.subr.bf16.mxu1 %v535_v9 }
  0x3a   :  { %490 = vmatpush3.bf16.msra.mxu0 %v535_v9  ;;  %522 = vmatpush3.bf16.msra.mxu1 %v535_v9 }
  0x3d   :  { %492 = vmatmul.mubr.bf16.vlgmr.msra.gmra.mxu0 %v538_v10  ;;  %500 = vmatmul.mubr.bf16.vlgmr.msra.gmra.mxu1 %v539_v11 }
  0x3e   :  { %495 = vmatprep.mubr.bf16.mxu0 %v540_v12  ;;  %503 = vmatprep.mubr.bf16.mxu1 %v541_v13 }
  0x45   :  { %496 = vmatmul.mubr.bf16.gmra.mxu0 %v542_v14  ;;  %504 = vmatmul.mubr.bf16.gmra.mxu1 %v543_v15 }
  0xfd   :  { %v493_v16 = vpop.f32.mrf.mxu0  ;;  %v501_v17 = vpop.f32.mrf.mxu1 }
  0xff   :  { %v203_v18 = vpop.f32.mrf.mxu0  ;;  %v235_v19 = vpop.f32.mrf.mxu1 }
 0x101   :  { %v494_v20 = vpop.f32.mrf.mxu0  ;;  %v502_v21 = vpop.f32.mrf.mxu1 }
 0x102   :  { %v420_v22 = vpack.c.bf16 %v494_v20, %v493_v16  ;;  %v440_v23 = vpack.c.bf16 %v502_v21, %v501_v17 }
 0x103   :  { %v206_v24 = vpop.f32.mrf.mxu0  ;;  %v238_v25 = vpop.f32.mrf.mxu1 }
 0x104   :  { %452 = vst [vmem:[#allocation7 + $0x8] sm:$0xff] %v420_v22   ;;  %456 = vst [vmem:[#allocation7 + $0x28] sm:$0xff] %v440_v23   ;;  %v415_v26 = vpack.c.bf16 %v206_v24, %v203_v18  ;;  %v435_v27 = vpack.c.bf16 %v238_v25, %v235_v19 }
 0x105   :  { %v497_v28 = vpop.f32.mrf.mxu0  ;;  %v505_v29 = vpop.f32.mrf.mxu1 }
 0x106   :  { %416 = vst [vmem:[#allocation7] sm:$0xff] %v415_v26   ;;  %455 = vst [vmem:[#allocation7 + $0x20] sm:$0xff] %v435_v27  }
 0x107   :  { %v219_v30 = vpop.f32.mrf.mxu0  ;;  %v251_v31 = vpop.f32.mrf.mxu1 }
 0x109   :  { %v498_v32 = vpop.f32.mrf.mxu0  ;;  %v506_v33 = vpop.f32.mrf.mxu1 }
 0x10a   :  { %v430_v34 = vpack.c.bf16 %v498_v32, %v497_v28  ;;  %v450_v35 = vpack.c.bf16 %v506_v33, %v505_v29 }
 0x10b   :  { %v222_v36 = vpop.f32.mrf.mxu0  ;;  %v254_v37 = vpop.f32.mrf.mxu1 }
 0x10c   :  { %454 = vst [vmem:[#allocation7 + $0x18] sm:$0xff] %v430_v34   ;;  %458 = vst [vmem:[#allocation7 + $0x38] sm:$0xff] %v450_v35   ;;  %v425_v38 = vpack.c.bf16 %v222_v36, %v219_v30  ;;  %v445_v39 = vpack.c.bf16 %v254_v37, %v251_v31 }
 0x10e   :  { %453 = vst [vmem:[#allocation7 + $0x10] sm:$0xff] %v425_v38   ;;  %457 = vst [vmem:[#allocation7 + $0x30] sm:$0xff] %v445_v39  }
 0x10f   :  { %595 = shalt.err (!%p592_p0)
}
 0x110   :  { %357 = dma.vmem_to_hbm [thread:$0]  %s352_s1, 1024, %s650_s2, [#allocation4], %s611_s12, %s611_s12, %s612_s13  }
 0x111   :  { %608 = dma.done.wait [#allocation4], 1024  }
 0x112   :  { %609 = vsyncadd [#allocation4], 4294966272 }
 0x113   :  { %361 = vsyncpa [#allocation3], 1 }
 0x114   :  { %362 = vsyncpa [#allocation6], 1 }
 0x115   :  { %363 = vsyncpa [#allocation4], 1 }

</bundles_post_ra>
